<compile_context>
chip_gen: v5e
topology: v5e:2x2
jax: 0.10.0
libtpu: 0.0.40
codegen_flags: <defaults>
</compile_context>

<pallas_src>
import math

import jax
import jax.numpy as jnp
from jax.experimental import pallas as pl
from jax.experimental.pallas import tpu as pltpu


def _layerscale_kernel(x_ref, gamma_ref, o_ref):
    # x_ref: (tile_rows, lane_dim); gamma_ref: (1, lane_dim), broadcast over rows.
    o_ref[...] = (x_ref[...] * gamma_ref[...]).astype(o_ref.dtype)


def _sublane_multiple(dtype) -> int:
    # Sub-32-bit dtypes pack along sublanes: f32 -> 8, bf16 -> 16, int8/fp8 -> 32.
    return {4: 8, 2: 16, 1: 32}.get(jnp.dtype(dtype).itemsize, 8)


def layer_scale(
    x: jax.Array,
    gamma: jax.Array,
    *,
    tile_rows: int | None = None,
    target_block_bytes: int = 2 << 20,  # ~2 MiB/block: >85% of HBM roofline,
                                        # 4 double-buffered copies fit every
                                        # chip's scoped-VMEM default (v5e..v7x).
) -> jax.Array:
    """Applies y = x * gamma with gamma (dim,) broadcast along the last axis of x."""
    orig_shape = x.shape
    dim = orig_shape[-1]
    assert gamma.shape == (dim,), f"gamma must have shape ({dim},), got {gamma.shape}"

    # PyTorch-typical case: gamma stored in f32 while x may be bf16.
    # Cast once in the wrapper so the kernel math/store stays in x.dtype.
    gamma = gamma.astype(x.dtype)

    x2d = x.reshape(-1, dim)
    rows = x2d.shape[0]

    # Lane-dense packing: if dim is not a multiple of 128, fold k rows into the
    # lane axis (pure layout plumbing; keeps output stores full-width).
    fold = 1
    lane_dim = dim
    if dim % 128 != 0:
        k = 128 // math.gcd(dim, 128)
        if rows % k == 0:
            fold = k
            lane_dim = k * dim
    rows_f = rows // fold
    if fold > 1:
        x2d = x2d.reshape(rows_f, lane_dim)
    gamma_row = jnp.tile(gamma, fold).reshape(1, lane_dim)

    itemsize = jnp.dtype(x.dtype).itemsize
    sub = _sublane_multiple(x.dtype)
    if tile_rows is None:
        t = max(sub, target_block_bytes // (lane_dim * itemsize))
        tile_rows = int((t // sub) * sub)
    if tile_rows >= rows_f:
        tile_rows = rows_f  # full-extent block along rows (always a legal shape)

    # Ragged last block is masked by Pallas for elementwise ops -> no pad copy.
    grid = (pl.cdiv(rows_f, tile_rows),)

    bytes_accessed = 2 * rows_f * lane_dim * itemsize + lane_dim * itemsize

    out2d = pl.pallas_call(
        _layerscale_kernel,
        out_shape=jax.ShapeDtypeStruct((rows_f, lane_dim), x.dtype),
        grid_spec=pltpu.PrefetchScalarGridSpec(
            num_scalar_prefetch=0,
            grid=grid,
            in_specs=[
                pl.BlockSpec((tile_rows, lane_dim), lambda i: (i, 0)),
                pl.BlockSpec((1, lane_dim), lambda i: (0, 0)),
            ],
            out_specs=pl.BlockSpec((tile_rows, lane_dim), lambda i: (i, 0)),
        ),
        compiler_params=pltpu.CompilerParams(
            dimension_semantics=("parallel",),     # shards rows across TCs on v7x
            vmem_limit_bytes=32 * 1024 * 1024,     # safe on 64 MiB (v7x) and 128 MiB chips
        ),
        cost_estimate=pl.CostEstimate(
            flops=rows_f * lane_dim,
            transcendentals=0,
            bytes_accessed=bytes_accessed,
        ),
    )(x2d, gamma_row)

    return out2d.reshape(orig_shape)


if __name__ == "__main__":
    # Shapes implied by a ViT token tensor: (batch, seq, dim)
    B, N, D = 2, 8, 32
    init_values = 1e-5

    key = jax.random.PRNGKey(0)
    x = jax.random.normal(key, (B, N, D), dtype=jnp.float32)

    # Deterministic parameter init, matching nn.Parameter(init_values * ones(dim))
    gamma = init_values * jnp.ones((D,), dtype=jnp.float32)

    # f32 path
    y = jax.block_until_ready(layer_scale(x, gamma))
    y_ref = x * gamma
    assert jnp.allclose(y, y_ref, atol=1e-7, rtol=1e-6), "f32 mismatch vs reference"

    # bf16 activations with f32 gamma (PyTorch-typical mixed-precision case)
    x_bf16 = x.astype(jnp.bfloat16)
    y_bf16 = jax.block_until_ready(layer_scale(x_bf16, gamma))
    y_bf16_ref = x_bf16 * gamma.astype(jnp.bfloat16)
    assert y_bf16.dtype == jnp.bfloat16
    assert jnp.allclose(
        y_bf16.astype(jnp.float32), y_bf16_ref.astype(jnp.float32), atol=1e-3, rtol=1e-2
    ), "bf16 mismatch vs reference"

    print("KERNEL_OK")
</pallas_src>

<mosaic_0001>
module attributes {stable_mosaic.version = 11 : i64} {
  func.func @_layerscale_kernel(%arg0: i32, %arg1: memref<4x128xf32, #tpu.memory_space<vmem>>, %arg2: memref<1x128xf32, #tpu.memory_space<vmem>>, %arg3: memref<4x128xf32, #tpu.memory_space<vmem>>) attributes {dimension_semantics = [#tpu.dimension_semantics<parallel>], iteration_bounds = array<i64: 1>, scalar_prefetch = 0 : i64, scratch_operands = 0 : i64, tpu.core_type = #tpu.core_type<tc>, window_params = [{transform_indices = @transform_0, window_bounds = array<i64: 4, 128>}, {pipeline_mode = #tpu.pipeline_mode<synchronous>, transform_indices = @transform_1, window_bounds = array<i64: 1, 128>}, {transform_indices = @transform_2, window_bounds = array<i64: 4, 128>}]} {
    %c0 = arith.constant 0 : index
    %c0_0 = arith.constant 0 : index
    %0 = vector.load %arg1[%c0, %c0_0] : memref<4x128xf32, #tpu.memory_space<vmem>>, vector<4x128xf32>
    %c0_1 = arith.constant 0 : index
    %c0_2 = arith.constant 0 : index
    %1 = vector.load %arg2[%c0_1, %c0_2] : memref<1x128xf32, #tpu.memory_space<vmem>>, vector<1x128xf32>
    %2 = vector.broadcast %1 : vector<1x128xf32> to vector<4x128xf32>
    %3 = arith.mulf %0, %2 : vector<4x128xf32>
    %c0_3 = arith.constant 0 : index
    %c0_4 = arith.constant 0 : index
    %4 = vector.load %arg3[%c0_3, %c0_4] : memref<4x128xf32, #tpu.memory_space<vmem>>, vector<4x128xf32>
    tpu.vector_store %arg3[%c0_3, %c0_4], %3 {strides = array<i32>} : memref<4x128xf32, #tpu.memory_space<vmem>>, vector<4x128xf32>,
    return
  }
  func.func @transform_0(%arg0: i32) -> (i32, i32) {
    %c0_i32 = arith.constant 0 : i32
    %c0_i32_0 = arith.constant 0 : i32
    return %arg0, %c0_i32 : i32, i32
  }
  func.func @transform_1(%arg0: i32) -> (i32, i32) {
    %c0_i32 = arith.constant 0 : i32
    %c0_i32_0 = arith.constant 0 : i32
    %c0_i32_1 = arith.constant 0 : i32
    return %c0_i32, %c0_i32_0 : i32, i32
  }
  func.func @transform_2(%arg0: i32) -> (i32, i32) {
    %c0_i32 = arith.constant 0 : i32
    %c0_i32_0 = arith.constant 0 : i32
    return %arg0, %c0_i32 : i32, i32
  }
}

</mosaic_0001>

<bundles_post_ra>
// kernel: tpu_custom_call.1
= control target key start
LH: loop header
LB: loop body
LE: loop exit
PB: predicated region body
PF: predicated region fallthrough
CT: control target
= control target key end

     0   :  { %7 = vsyncpa [#allocation3], 0  ;;  %s174_s0 = inlined_call_operand.hbm [shape: f32[4,128], index: 0, kind: input, shape index: {}]   ;;  %s175_s1 = inlined_call_operand.hbm [shape: f32[1,128], index: 1, kind: input, shape index: {}]   ;;  %s176_s2 = inlined_call_operand.hbm [shape: f32[4,128], index: 2, kind: output, shape index: {}]  }
   0x1   :  { %8 = vsyncpa [#allocation6], 0 }
   0x2   :  { %9 = vsyncpa [#allocation4], 0  ;;  %s15_s11 = sshll.u32 %s174_s0, 4  ;;  %s147_s12 = smov [#allocation2]   ;;  %s16_s11 = int_to_ptr.hbm [resolvable:$true] %s15_s11 }
   0x3   :  { %s17_s13 = sshll.u32 %s147_s12, 4  ;;  %s26_s16 = sshll.u32 %s175_s1, 4  ;;  %s18_s13 = int_to_ptr.vmem [resolvable:$true] %s17_s13  ;;  %s27_s16 = int_to_ptr.hbm [resolvable:$true] %s26_s16 }
   0x4   :  { %20 = dma.hbm_to_vmem [thread:$0]  %s16_s11, 64, %s18_s13, [#allocation3]  }
   0x5   :  { %s148_s17 = smov [#allocation5]  }
   0x6   :  { %s28_s18 = sshll.u32 %s148_s17, 4  ;;  %s29_s18 = int_to_ptr.vmem [resolvable:$true] %s28_s18 }
   0x7   :  { %31 = dma.hbm_to_vmem [thread:$0]  %s27_s16, 16, %s29_s18, [#allocation6]  }
   0x8   :  { %141 = dma.done.wait [#allocation3], 64  }
   0x9   :  { %142 = vsyncadd [#allocation3], 4294967232 }
   0xa   :  { %143 = dma.done.wait [#allocation6], 16  }
   0xb   :  { %144 = vsyncadd [#allocation6], 4294967280  ;;  %s149_s19 = smov [#allocation7]   ;;  %s54_s22 = sshll.u32 %s176_s2, 4  ;;  %v40_v0 = vld [vmem:[#allocation2] sm:$0xf]  ;;  %s55_s22 = int_to_ptr.hbm [resolvable:$true] %s54_s22 }
   0xc   :  { %s52_s0 = sshll.u32 %s149_s19, 4  ;;  %v68_v1 = vld [vmem:[#allocation5] ss:$0 sm:$0xff]  ;;  %s53_s0 = int_to_ptr.vmem [resolvable:$true] %s52_s0 }
   0xd   :  { %v45_v2 = vmul.f32 %v68_v1, %v40_v0 }
   0xf   :  { %46 = vst [vmem:[#allocation7] sm:$0xf] %v45_v2 }
  0x10   :  { %57 = dma.vmem_to_hbm [thread:$0]  %s53_s0, 64, %s55_s22, [#allocation4]  }
  0x11   :  { %145 = dma.done.wait [#allocation4], 64  }
  0x12   :  { %146 = vsyncadd [#allocation4], 4294967232 }
  0x13   :  { %62 = vsyncpa [#allocation3], 1 }
  0x14   :  { %63 = vsyncpa [#allocation6], 1 }
  0x15   :  { %64 = vsyncpa [#allocation4], 1 }

</bundles_post_ra>
